<compile_context>
chip_gen: v7x
topology: tpu7x:2x2x1
jax: 0.10.0
libtpu: 0.0.40
codegen_flags: <defaults>
</compile_context>

<pallas_src>
import functools

import jax
import jax.numpy as jnp
from jax.experimental import pallas as pl
from jax.experimental.pallas import tpu as pltpu


def _round_up(v, m):
    return ((v + m - 1) // m) * m


def _vmem_limit_bytes():
    """~80% of physical per-core VMEM, capped at 100 MiB (v5e/v6e)."""
    try:
        cap = int(pltpu.get_tpu_info().vmem_capacity_bytes)
    except Exception:  # not on TPU / older API -> conservative default
        cap = 64 * 1024 * 1024
    return int(min(cap * 4 // 5, 100 * 1024 * 1024))


def _choose_tn(n, nsp):
    """Largest power-of-two tile <=1024 s.t. the (TN, Nsp) f32 transient <=8MiB."""
    cap_by_f = max(128, (8 * 1024 * 1024) // (nsp * 4))
    np_min = _round_up(n, 128)
    tn = 128
    while tn * 2 <= min(1024, cap_by_f) and tn * 2 <= np_min:
        tn *= 2
    return tn


# --------------------------- prologue: phi^T and g --------------------------
def _prologue_kernel(corners_ref, wpg_ref, bpg_ref, phi_t_ref, g_ref, *, ns, cip):
    """Grid = (B,).

    corners_ref : (1, 4, Nsp, Cp) bf16 -- the 4 corners of every 2x2 pool window
    wpg_ref     : (Cp, 2*Cip)     bf16 -- phi || g 1x1-conv weights
    bpg_ref     : (1, 2*Cip)      f32  -- phi || g biases
    phi_t_ref   : (1, Cip, Nsp)   bf16
    g_ref       : (1, Nsp, Cip)   bf16
    """
    nsp = g_ref.shape[1]
    wpg = wpg_ref[...]
    # conv then 2x2 max-pool == max over the four corner projections.
    # Chunked over corners: 4 small matmuls, no (4*Nsp, 2*Cip) f32 transient.
    pooled = jnp.dot(corners_ref[0, 0], wpg, preferred_element_type=jnp.float32)
    for c in range(1, 4):
        pooled = jnp.maximum(
            pooled,
            jnp.dot(corners_ref[0, c], wpg, preferred_element_type=jnp.float32))
    # Add biases, then force padded pooled positions (rows >= ns) to exact 0 so
    # they contribute nothing to the (no-softmax) attention sums.
    row_ids = jax.lax.broadcasted_iota(jnp.int32, (nsp, 1), 0)
    pooled = jnp.where(row_ids < ns, pooled + bpg_ref[...], 0.0)
    phi_t_ref[0] = pooled[:, :cip].T.astype(phi_t_ref.dtype)   # one small transpose
    g_ref[0] = pooled[:, cip:].astype(g_ref.dtype)


# ------------------------------- main kernel --------------------------------
def _main_kernel(x_ref, phi_t_ref, g_ref, wt_ref, bt_ref, ww_ref, bw_ref,
                 out_ref, *, inv_ns):
    """Grid = (B, Np // TN), both axes parallel.

    x_ref     : (1, TN, Cp)   f32  channels-last pixels
    phi_t_ref : (1, Cip, Nsp) bf16
    g_ref     : (1, Nsp, Cip) bf16
    wt_ref    : (Cp, Cip)     bf16  theta 1x1 conv
    bt_ref    : (1, Cip)      f32   theta bias
    ww_ref    : (Cip, Cp)     bf16  W 1x1 conv with eval-mode BN folded
    bw_ref    : (1, Cp)       f32   W bias (BN folded)
    out_ref   : (1, TN, Cp)   f32
    """
    x = x_ref[0]                                                   # (TN, Cp) f32
    theta = (jnp.dot(x.astype(jnp.bfloat16), wt_ref[...],
                     preferred_element_type=jnp.float32)
             + bt_ref[...]) * inv_ns                               # (TN, Cip)
    # f/Ns = (theta/Ns) @ phi^T  -- plain NN MXU matmul.
    f = jnp.dot(theta.astype(jnp.bfloat16), phi_t_ref[0],
                preferred_element_type=jnp.float32)                # (TN, Nsp)
    y = jnp.dot(f.astype(jnp.bfloat16), g_ref[0],
                preferred_element_type=jnp.float32)                # (TN, Cip)
    w_y = jnp.dot(y.astype(jnp.bfloat16), ww_ref[...],
                  preferred_element_type=jnp.float32) + bw_ref[...]  # (TN, Cp)
    out_ref[0] = (w_y + x).astype(out_ref.dtype)                   # residual, f32


def nonlocal_block_pallas(x_nchw, params):
    """x_nchw: (B, C, H, W) float32. Returns z with the same shape (NCHW)."""
    B, C, H, W = x_nchw.shape
    assert H % 2 == 0 and W % 2 == 0
    N = H * W
    Ns = (H // 2) * (W // 2)
    Ci = params["w_theta"].shape[0]

    # Lane-dense padded sizes (no extra "ones" channel).
    Cp = _round_up(C, 128)
    Cip = _round_up(Ci, 128)
    Nsp = _round_up(Ns, 128)
    TN = _choose_tn(N, Nsp)
    Np = _round_up(N, TN)

    vmem_limit = _vmem_limit_bytes()

    # ---------------- glue: channels-last, padded, f32 pixels ----------------
    x_nhwc = jnp.transpose(x_nchw, (0, 2, 3, 1)).astype(jnp.float32)   # (B,H,W,C)
    x_flat = x_nhwc.reshape(B, N, C)
    x_full = jnp.pad(x_flat, ((0, 0), (0, Np - N), (0, Cp - C)))       # (B,Np,Cp)

    # 2x2 pool corners stacked on a corner axis; pooled-position axis padded.
    corners = jnp.stack(
        [x_nhwc[:, 0::2, 0::2, :], x_nhwc[:, 0::2, 1::2, :],
         x_nhwc[:, 1::2, 0::2, :], x_nhwc[:, 1::2, 1::2, :]],
        axis=1).reshape(B, 4, Ns, C)
    corners = jnp.pad(corners, ((0, 0), (0, 0), (0, Nsp - Ns), (0, Cp - C)))
    corners = corners.astype(jnp.bfloat16)                             # (B,4,Nsp,Cp)

    # phi || g fused weight + bias row.
    wpg = jnp.zeros((Cp, 2 * Cip), jnp.float32)
    wpg = wpg.at[:C, :Ci].set(params["w_phi"].T)
    wpg = wpg.at[:C, Cip:Cip + Ci].set(params["w_g"].T)
    wpg = wpg.astype(jnp.bfloat16)
    bpg = jnp.zeros((1, 2 * Cip), jnp.float32)
    bpg = bpg.at[0, :Ci].set(params["b_phi"])
    bpg = bpg.at[0, Cip:Cip + Ci].set(params["b_g"])

    # theta weight / bias.
    wt = jnp.zeros((Cp, Cip), jnp.float32).at[:C, :Ci].set(params["w_theta"].T)
    wt = wt.astype(jnp.bfloat16)
    bt = jnp.zeros((1, Cip), jnp.float32).at[0, :Ci].set(params["b_theta"])

    # W 1x1 conv with eval-mode BatchNorm folded in.
    eps = 1e-5
    scale = params["bn_gamma"] / jnp.sqrt(params["bn_var"] + eps)       # (C,)
    ww = jnp.zeros((Cip, Cp), jnp.float32)
    ww = ww.at[:Ci, :C].set(params["w_W"].T * scale[None, :])
    ww = ww.astype(jnp.bfloat16)
    bw = jnp.zeros((1, Cp), jnp.float32)
    bw = bw.at[0, :C].set(scale * (params["b_W"] - params["bn_mean"])
                          + params["bn_beta"])

    # --------------------------- prologue: phi^T, g --------------------------
    pro_flops = 2 * B * 4 * Nsp * Cp * (2 * Cip)
    pro_bytes = (B * 4 * Nsp * Cp * 2 + Cp * 2 * Cip * 2
                 + B * 2 * Nsp * Cip * 2)
    phi_t, g = pl.pallas_call(
        functools.partial(_prologue_kernel, ns=Ns, cip=Cip),
        out_shape=(jax.ShapeDtypeStruct((B, Cip, Nsp), jnp.bfloat16),
                   jax.ShapeDtypeStruct((B, Nsp, Cip), jnp.bfloat16)),
        grid_spec=pltpu.PrefetchScalarGridSpec(
            num_scalar_prefetch=0,
            grid=(B,),
            in_specs=[
                pl.BlockSpec((1, 4, Nsp, Cp), lambda b: (b, 0, 0, 0)),
                pl.BlockSpec(wpg.shape, lambda b: (0, 0)),
                pl.BlockSpec(bpg.shape, lambda b: (0, 0)),
            ],
            out_specs=[
                pl.BlockSpec((1, Cip, Nsp), lambda b: (b, 0, 0)),
                pl.BlockSpec((1, Nsp, Cip), lambda b: (b, 0, 0)),
            ],
        ),
        compiler_params=pltpu.CompilerParams(
            dimension_semantics=("parallel",),
            vmem_limit_bytes=vmem_limit),
        cost_estimate=pl.CostEstimate(flops=pro_flops, transcendentals=0,
                                      bytes_accessed=pro_bytes),
    )(corners, wpg, bpg)

    # ------------------------------ main kernel ------------------------------
    main_flops = 2 * B * Np * (Cp * Cip + 2 * Cip * Nsp + Cip * Cp)
    main_bytes = (B * Np * Cp * 4 * 2 + B * 2 * Nsp * Cip * 2
                  + 2 * Cp * Cip * 2 + (Cip + Cp) * 4)
    out = pl.pallas_call(
        functools.partial(_main_kernel, inv_ns=float(1.0 / Ns)),
        out_shape=jax.ShapeDtypeStruct((B, Np, Cp), jnp.float32),
        grid_spec=pltpu.PrefetchScalarGridSpec(
            num_scalar_prefetch=0,
            grid=(B, Np // TN),
            in_specs=[
                pl.BlockSpec((1, TN, Cp), lambda b, t: (b, t, 0)),     # x
                pl.BlockSpec((1, Cip, Nsp), lambda b, t: (b, 0, 0)),   # phi^T
                pl.BlockSpec((1, Nsp, Cip), lambda b, t: (b, 0, 0)),   # g
                pl.BlockSpec(wt.shape, lambda b, t: (0, 0)),
                pl.BlockSpec(bt.shape, lambda b, t: (0, 0)),
                pl.BlockSpec(ww.shape, lambda b, t: (0, 0)),
                pl.BlockSpec(bw.shape, lambda b, t: (0, 0)),
            ],
            out_specs=pl.BlockSpec((1, TN, Cp), lambda b, t: (b, t, 0)),
        ),
        compiler_params=pltpu.CompilerParams(
            dimension_semantics=("parallel", "parallel"),
            vmem_limit_bytes=vmem_limit),
        cost_estimate=pl.CostEstimate(flops=main_flops, transcendentals=0,
                                      bytes_accessed=main_bytes),
    )(x_full, phi_t, g, wt, bt, ww, bw)

    # strip N/channel padding, back to NCHW.
    # TODO(synk): if the consumer accepts NHWC / padded channels, return
    # out[:, :N] directly and skip this extra pass over the output.
    z = out[:, :N, :C].reshape(B, H, W, C)
    return jnp.transpose(z, (0, 3, 1, 2))


# ------------------------- pure-JAX reference (f32) -------------------------
def nonlocal_block_ref(x, params):
    B, C, H, W = x.shape
    Ci = params["w_theta"].shape[0]
    eps = 1e-5

    def conv1x1(inp, w, b):   # w: (Cout, Cin), b: (Cout,)
        return jnp.einsum("bchw,oc->bohw", inp, w) + b[None, :, None, None]

    def maxpool2(inp):
        b_, c_, h_, w_ = inp.shape
        return jnp.max(inp.reshape(b_, c_, h_ // 2, 2, w_ // 2, 2), axis=(3, 5))

    g_x = maxpool2(conv1x1(x, params["w_g"], params["b_g"]))
    g_x = g_x.reshape(B, Ci, -1).transpose(0, 2, 1)
    theta_x = conv1x1(x, params["w_theta"], params["b_theta"])
    theta_x = theta_x.reshape(B, Ci, -1).transpose(0, 2, 1)
    phi_x = maxpool2(conv1x1(x, params["w_phi"], params["b_phi"]))
    phi_x = phi_x.reshape(B, Ci, -1)

    f = jnp.matmul(theta_x, phi_x)
    f_div_c = f / f.shape[-1]
    y = jnp.matmul(f_div_c, g_x)
    y = y.transpose(0, 2, 1).reshape(B, Ci, H, W)

    w_y = conv1x1(y, params["w_W"], params["b_W"])
    w_y = (params["bn_gamma"][None, :, None, None]
           * (w_y - params["bn_mean"][None, :, None, None])
           / jnp.sqrt(params["bn_var"] + eps)[None, :, None, None]
           + params["bn_beta"][None, :, None, None])
    return w_y + x


if __name__ == "__main__":
    B, C, H, W = 2, 4, 16, 16
    Ci = C // 2   # inter_channels

    key = jax.random.PRNGKey(0)
    ks = jax.random.split(key, 12)

    params = {
        # 1x1 conv weights with the trailing (1,1) squeezed: (Cout, Cin)
        "w_theta": jax.random.normal(ks[0], (Ci, C), jnp.float32) * 0.2,
        "b_theta": jax.random.normal(ks[1], (Ci,), jnp.float32) * 0.1,
        "w_phi":   jax.random.normal(ks[2], (Ci, C), jnp.float32) * 0.2,
        "b_phi":   jax.random.normal(ks[3], (Ci,), jnp.float32) * 0.1,
        "w_g":     jax.random.normal(ks[4], (Ci, C), jnp.float32) * 0.2,
        "b_g":     jax.random.normal(ks[5], (Ci,), jnp.float32) * 0.1,
        "w_W":     jax.random.normal(ks[6], (C, Ci), jnp.float32) * 0.2,
        "b_W":     jax.random.normal(ks[7], (C,), jnp.float32) * 0.1,
        # eval-mode BatchNorm2d params (non-zero so the branch is exercised)
        "bn_gamma": jax.random.normal(ks[8], (C,), jnp.float32) * 0.5 + 1.0,
        "bn_beta":  jax.random.normal(ks[9], (C,), jnp.float32) * 0.1,
        "bn_mean":  jax.random.normal(ks[10], (C,), jnp.float32) * 0.1,
        "bn_var":   jax.nn.softplus(jax.random.normal(ks[11], (C,), jnp.float32)) + 0.5,
    }

    x = jax.random.normal(jax.random.PRNGKey(42), (B, C, H, W), jnp.float32)

    z = jax.block_until_ready(nonlocal_block_pallas(x, params))
    z_ref = jax.block_until_ready(nonlocal_block_ref(x, params))

    assert z.shape == (B, C, H, W)
    # bf16 MXU matmuls with f32 accumulation -> loosened tolerance vs f32 ref.
    max_err = jnp.max(jnp.abs(z - z_ref))
    assert jnp.allclose(z, z_ref, atol=2e-2, rtol=2e-2), f"max abs err {max_err}"
    print("KERNEL_OK")
</pallas_src>

<mosaic_0001>
module attributes {stable_mosaic.version = 11 : i64} {
  func.func @_prologue_kernel(%arg0: i32, %arg1: memref<1x4x128x128xbf16, #tpu.memory_space<vmem>>, %arg2: memref<128x256xbf16, #tpu.memory_space<vmem>>, %arg3: memref<1x256xf32, #tpu.memory_space<vmem>>, %arg4: memref<1x128x128xbf16, #tpu.memory_space<vmem>>, %arg5: memref<1x128x128xbf16, #tpu.memory_space<vmem>>) attributes {dimension_semantics = [#tpu.dimension_semantics<parallel>], iteration_bounds = array<i64: 2>, scalar_prefetch = 0 : i64, scratch_operands = 0 : i64, tpu.core_type = #tpu.core_type<tc>, window_params = [{transform_indices = @transform_0, window_bounds = array<i64: 1, 4, 128, 128>}, {pipeline_mode = #tpu.pipeline_mode<synchronous>, transform_indices = @transform_1, window_bounds = array<i64: 128, 256>}, {pipeline_mode = #tpu.pipeline_mode<synchronous>, transform_indices = @transform_2, window_bounds = array<i64: 1, 256>}, {transform_indices = @transform_3, window_bounds = array<i64: 1, 128, 128>}, {transform_indices = @transform_4, window_bounds = array<i64: 1, 128, 128>}]} {
    %c0 = arith.constant 0 : index
    %c0_0 = arith.constant 0 : index
    %0 = vector.load %arg2[%c0, %c0_0] : memref<128x256xbf16, #tpu.memory_space<vmem>>, vector<128x256xbf16>
    %c0_1 = arith.constant 0 : index
    %c0_2 = arith.constant 0 : index
    %c0_3 = arith.constant 0 : index
    %c0_4 = arith.constant 0 : index
    %1 = vector.load %arg1[%c0_1, %c0_2, %c0_3, %c0_4] : memref<1x4x128x128xbf16, #tpu.memory_space<vmem>>, vector<1x1x128x128xbf16>
    %2 = vector.shape_cast %1 : vector<1x1x128x128xbf16> to vector<128x128xbf16>
    %cst = arith.constant dense<0.000000e+00> : vector<128x256xf32>
    %3 = tpu.matmul %2, %0, %cst {dimension_numbers = #tpu.dot_dimension_numbers<[1], [0], [0], [1], [0, 0, 1, 1], [], []>} : vector<128x128xbf16>, vector<128x256xbf16>, vector<128x256xf32> -> vector<128x256xf32>
    %c0_5 = arith.constant 0 : index
    %c1 = arith.constant 1 : index
    %c0_6 = arith.constant 0 : index
    %c0_7 = arith.constant 0 : index
    %4 = vector.load %arg1[%c0_5, %c1, %c0_6, %c0_7] : memref<1x4x128x128xbf16, #tpu.memory_space<vmem>>, vector<1x1x128x128xbf16>
    %5 = vector.shape_cast %4 : vector<1x1x128x128xbf16> to vector<128x128xbf16>
    %cst_8 = arith.constant dense<0.000000e+00> : vector<128x256xf32>
    %6 = tpu.matmul %5, %0, %cst_8 {dimension_numbers = #tpu.dot_dimension_numbers<[1], [0], [0], [1], [0, 0, 1, 1], [], []>} : vector<128x128xbf16>, vector<128x256xbf16>, vector<128x256xf32> -> vector<128x256xf32>
    %7 = arith.maximumf %3, %6 : vector<128x256xf32>
    %c0_9 = arith.constant 0 : index
    %c2 = arith.constant 2 : index
    %c0_10 = arith.constant 0 : index
    %c0_11 = arith.constant 0 : index
    %8 = vector.load %arg1[%c0_9, %c2, %c0_10, %c0_11] : memref<1x4x128x128xbf16, #tpu.memory_space<vmem>>, vector<1x1x128x128xbf16>
    %9 = vector.shape_cast %8 : vector<1x1x128x128xbf16> to vector<128x128xbf16>
    %cst_12 = arith.constant dense<0.000000e+00> : vector<128x256xf32>
    %10 = tpu.matmul %9, %0, %cst_12 {dimension_numbers = #tpu.dot_dimension_numbers<[1], [0], [0], [1], [0, 0, 1, 1], [], []>} : vector<128x128xbf16>, vector<128x256xbf16>, vector<128x256xf32> -> vector<128x256xf32>
    %11 = arith.maximumf %7, %10 : vector<128x256xf32>
    %c0_13 = arith.constant 0 : index
    %c3 = arith.constant 3 : index
    %c0_14 = arith.constant 0 : index
    %c0_15 = arith.constant 0 : index
    %12 = vector.load %arg1[%c0_13, %c3, %c0_14, %c0_15] : memref<1x4x128x128xbf16, #tpu.memory_space<vmem>>, vector<1x1x128x128xbf16>
    %13 = vector.shape_cast %12 : vector<1x1x128x128xbf16> to vector<128x128xbf16>
    %cst_16 = arith.constant dense<0.000000e+00> : vector<128x256xf32>
    %14 = tpu.matmul %13, %0, %cst_16 {dimension_numbers = #tpu.dot_dimension_numbers<[1], [0], [0], [1], [0, 0, 1, 1], [], []>} : vector<128x128xbf16>, vector<128x256xbf16>, vector<128x256xf32> -> vector<128x256xf32>
    %15 = arith.maximumf %11, %14 : vector<128x256xf32>
    %16 = tpu.iota {dimensions = array<i32: 0>} : vector<128x1xi32>
    %c64_i32 = arith.constant 64 : i32
    %17 = vector.broadcast %c64_i32 : i32 to vector<128x1xi32>
    %18 = arith.cmpi slt, %16, %17 : vector<128x1xi32>
    %c0_17 = arith.constant 0 : index
    %c0_18 = arith.constant 0 : index
    %19 = vector.load %arg3[%c0_17, %c0_18] : memref<1x256xf32, #tpu.memory_space<vmem>>, vector<1x256xf32>
    %20 = vector.broadcast %19 : vector<1x256xf32> to vector<128x256xf32>
    %21 = arith.addf %15, %20 : vector<128x256xf32>
    %cst_19 = arith.constant 0.000000e+00 : f32
    %22 = vector.shape_cast %18 : vector<128x1xi1> to vector<128x1xi1>
    %23 = vector.broadcast %22 : vector<128x1xi1> to vector<128x256xi1>
    %24 = vector.broadcast %cst_19 : f32 to vector<128x256xf32>
    %25 = arith.select %23, %21, %24 : vector<128x256xi1>, vector<128x256xf32>
    %26 = vector.extract_strided_slice %25 {offsets = [0, 0], sizes = [128, 128], strides = [1, 1]} : vector<128x256xf32> to vector<128x128xf32>
    %27 = tpu.transpose %26, [1, 0] : vector<128x128xf32> -> vector<128x128xf32>
    %28 = arith.truncf %27 : vector<128x128xf32> to vector<128x128xbf16>
    %c0_20 = arith.constant 0 : index
    %c0_21 = arith.constant 0 : index
    %c0_22 = arith.constant 0 : index
    %29 = vector.load %arg4[%c0_20, %c0_21, %c0_22] : memref<1x128x128xbf16, #tpu.memory_space<vmem>>, vector<1x128x128xbf16>
    %30 = vector.shape_cast %29 : vector<1x128x128xbf16> to vector<128x128xbf16>
    %31 = vector.shape_cast %28 : vector<128x128xbf16> to vector<1x128x128xbf16>
    tpu.vector_store %arg4[%c0_20, %c0_21, %c0_22], %31 {strides = array<i32>} : memref<1x128x128xbf16, #tpu.memory_space<vmem>>, vector<1x128x128xbf16>,
    %32 = vector.extract_strided_slice %25 {offsets = [0, 128], sizes = [128, 128], strides = [1, 1]} : vector<128x256xf32> to vector<128x128xf32>
    %33 = arith.truncf %32 : vector<128x128xf32> to vector<128x128xbf16>
    %c0_23 = arith.constant 0 : index
    %c0_24 = arith.constant 0 : index
    %c0_25 = arith.constant 0 : index
    %34 = vector.load %arg5[%c0_23, %c0_24, %c0_25] : memref<1x128x128xbf16, #tpu.memory_space<vmem>>, vector<1x128x128xbf16>
    %35 = vector.shape_cast %34 : vector<1x128x128xbf16> to vector<128x128xbf16>
    %36 = vector.shape_cast %33 : vector<128x128xbf16> to vector<1x128x128xbf16>
    tpu.vector_store %arg5[%c0_23, %c0_24, %c0_25], %36 {strides = array<i32>} : memref<1x128x128xbf16, #tpu.memory_space<vmem>>, vector<1x128x128xbf16>,
    return
  }
  func.func @transform_0(%arg0: i32) -> (i32, i32, i32, i32) {
    %c0_i32 = arith.constant 0 : i32
    %c0_i32_0 = arith.constant 0 : i32
    %c0_i32_1 = arith.constant 0 : i32
    %c0_i32_2 = arith.constant 0 : i32
    return %arg0, %c0_i32, %c0_i32_0, %c0_i32_1 : i32, i32, i32, i32
  }
  func.func @transform_1(%arg0: i32) -> (i32, i32) {
    %c0_i32 = arith.constant 0 : i32
    %c0_i32_0 = arith.constant 0 : i32
    %c0_i32_1 = arith.constant 0 : i32
    return %c0_i32, %c0_i32_0 : i32, i32
  }
  func.func @transform_2(%arg0: i32) -> (i32, i32) {
    %c0_i32 = arith.constant 0 : i32
    %c0_i32_0 = arith.constant 0 : i32
    %c0_i32_1 = arith.constant 0 : i32
    return %c0_i32, %c0_i32_0 : i32, i32
  }
  func.func @transform_3(%arg0: i32) -> (i32, i32, i32) {
    %c0_i32 = arith.constant 0 : i32
    %c0_i32_0 = arith.constant 0 : i32
    %c0_i32_1 = arith.constant 0 : i32
    return %arg0, %c0_i32, %c0_i32_0 : i32, i32, i32
  }
  func.func @transform_4(%arg0: i32) -> (i32, i32, i32) {
    %c0_i32 = arith.constant 0 : i32
    %c0_i32_0 = arith.constant 0 : i32
    %c0_i32_1 = arith.constant 0 : i32
    return %arg0, %c0_i32, %c0_i32_0 : i32, i32, i32
  }
}

</mosaic_0001>

<bundles_post_ra>
// kernel: tpu_custom_call.1
= control target key start
LH: loop header
LB: loop body
LE: loop exit
PB: predicated region body
PF: predicated region fallthrough
CT: control target
= control target key end

     0   :  { %10 = vsyncpa [#allocation3], 0  ;;  %s2706_s0 = inlined_call_operand.hbm [shape: bf16[2,4,128,128], index: 0, kind: input, shape index: {}]   ;;  %s2707_s1 = inlined_call_operand.hbm [shape: bf16[128,256], index: 1, kind: input, shape index: {}]   ;;  %s2708_s2 = inlined_call_operand.vmem [shape: f32[1,256], index: 2, kind: input, shape index: {}]   ;;  %s2709_s3 = inlined_call_operand.hbm [shape: bf16[2,128,128], index: 3, kind: output, shape index: {0}]   ;;  %s2710_s4 = inlined_call_operand.hbm [shape: bf16[2,128,128], index: 4, kind: output, shape index: {1}]  }
   0x1   :  { %12 = vsyncpa [#allocation3 + $0x1], 0 }
   0x2   :  { %13 = vsyncpa [#allocation6], 0 }
   0x3   :  { %14 = vsyncpa [#allocation4], 0 }
   0x4   :  { %16 = vsyncpa [#allocation4 + $0x1], 0 }
   0x5   :  { %17 = vsyncpa [#allocation9], 0 }
   0x6   :  { %19 = vsyncpa [#allocation9 + $0x1], 0  ;;  %s2200_s15 = smov 0   ;;  %s2202_s16 = smov 0  }
   0x7   :  { %s2204_s17 = smov 0   ;;  %s2206_s18 = smov 0  }
   0x8 LB: > { %s2221_s19 = sadd.s32 4294967295, %s2161_s18   ;;  %s1629_s20 = sadd.s32 4294967294, %s2161_s18   ;;  %s2161_s18 = sphi %s2206_s18, %s2734_s18   ;;  %s2157_s17 = sphi %s2204_s17, %s2733_s17   ;;  %s2153_s16 = sphi %s2202_s16, %s2732_s16   ;;  %s2149_s15 = sphi %s2200_s15, %s2731_s15  }
   0x9   : > { %p45_p0 = scmp.ne.s32.totalorder %s2153_s16, %s2149_s15  ;;  %p2711_p1 = scmp.eq.s32.totalorder %s2221_s19, 0 }
   0xa   : > { %p117_p3 = scmp.eq.s32.totalorder %s1629_s20, 1  ;;  %p1630_p5 = scmp.ge.s32.totalorder %s2161_s18, 1 }
   0xb   : > { %p2230_p4 = por %p2711_p1, %p45_p0  ;;  %p150_p7 = scmp.lt.s32.totalorder %s2161_s18, 3 }
   0xc   : > { %p2235_p6 = por %p117_p3, %p45_p0  ;;  %s2163_s24 = smov [#allocation5]  }
   0xd   : > { %s2714_s21 = scalar_select %p2230_p4, 1, 0 }
   0xe   : > { %s2715_s22 = scalar_select %p2235_p6, 1, 0 }
   0xf   : > { %p2240_p8 = pnand %p1630_p5, %p150_p7  ;;  %s162_s25 = sshll.u32 %s2163_s24, 4  ;;  %s2244_s25 = int_to_ptr.vmem [resolvable:$true] %s162_s25 }
  0x10   : > { %s2256_s27 = sadd.s32 1, %s2161_s18   ;;  %s32_s28 = sadd.s32 1, %s2157_s17 }
  0x11   : > { %s2716_s23 = scalar_select %p2240_p8, 1, 0 }
  0x12   : > { %p1884_p9 = pneg %p2240_p8  ;;  %s29_s29 = ssub.s32 %s2161_s18, %s2256_s27 }
  0x13   : > { %s2001_s6 = scalar_lea.hbm %s2707_s1, 2048 }
  0x14   : > { %p2251_p11 = pnand %p1884_p9, %p2711_p1  ;;  %p2002_p12 = scmp.ne.s32.totalorder %s2707_s1, %s2001_s6 }
  0x15   : > { %p2008_p5 = scmp.lt.u32.totalorder %s2001_s6, %s2707_s1 }
  0x16   : > { %p2003_p13 = pneg %p2251_p11 }
  0x18   : > { %p2004_p0 = pnand %p2003_p13, %p2002_p12 }
  0x1a   : > { %p2005_p3 = pneg %p2004_p0 }
  0x1c   : > { %p2010_p7 = pnand %p2008_p5, %p2005_p3 }
  0x1e   : > { %2013 = shalt.err (!%p2010_p7)
}
  0x1f   : > { %s2014_s11 = scalar_lea.vmem %s2244_s25, 2048  ;;  %p2022_p2 = scmp.lt.s32.totalorder %s2244_s25, %s2244_s25 }
  0x20   : > { %p2015_p9 = scmp.ne.s32.totalorder %s2244_s25, %s2014_s11  ;;  %p2023_p6 = scmp.lt.s32.totalorder %s2014_s11, %s2014_s11 }
  0x22   : > { %p2017_p10 = pnand %p2015_p9, %p2003_p13  ;;  %p2024_p4 = por %p2023_p6, %p2022_p2 }
  0x24   : > { %p2018_p1 = pneg %p2017_p10 }
  0x26   : > { %p2025_p8 = pnand %p2024_p4, %p2018_p1 }
  0x28   : > { %2028 = shalt.err (!%p2025_p8)
}
  0x29   : > { %s2164_s12 = smov 128   ;;  %s2165_s13 = smov 8  }
  0x2a   : > { %1887 = dma.hbm_to_vmem [thread:$0]  (!%p2251_p11), %s2707_s1, 2048, %s2244_s25, [#allocation6], %s2164_s12, %s2164_s12, %s2165_s13  }
  0x2b   : > { %p30_p2 = scmp.eq.s32.totalorder %s29_s29, 0  ;;  %p39_p1 = scmp.ne.s32.totalorder %s2157_s17, %s2153_s16 }
  0x2c   : > { %p40_p4 = scmp.eq.s32.totalorder %s2161_s18, 0  ;;  %p1900_p6 = scmp.lt.s32.totalorder %s2161_s18, 2 }
  0x2d   : > { %s2287_s24 = scalar_select %p30_p2, %s2157_s17, %s32_s28  }
  0x2e   : > { %p41_p8 = por %p40_p4, %p39_p1  ;;  %p2718_p10 = scmp.eq.s32.totalorder %s2221_s19, 1 }
  0x2f   : > { %s179_s5 = sand.u32 1, %s2157_s17   ;;  %s1777_s6 = sshll.u32 %s2161_s18, 12 }
  0x30   : > { %p2291_p12 = por %p2718_p10, %p39_p1  ;;  %s1633_s7 = sshll.u32 %s179_s5, 8 }
  0x31   : > { %s2300_s9 = scalar_lea.hbm %s2706_s0, %s1777_s6  ;;  %s183_s25 = scalar_lea.vmem [#allocation2], %s1633_s7 }
  0x32   : > { %s190_s28 = sshll.u32 %s183_s25, 4  ;;  %p2302_p11 = pnand %p1900_p6, %p41_p8  ;;  %s2306_s28 = int_to_ptr.vmem [resolvable:$true] %s190_s28 }
  0x33   : > { %s2308_s10 = scalar_lea.sflag [#allocation3], %s179_s5  ;;  %s2029_s11 = scalar_lea.hbm %s2300_s9, 4096 }
  0x34   : > { %p2030_p13 = scmp.ne.s32.totalorder %s2300_s9, %s2029_s11  ;;  %p2031_p0 = pneg %p2302_p11 }
  0x35   : > { %s2034_s14 = scalar_lea.hbm %s2706_s0, 8192  ;;  %p2035_p7 = scmp.lt.u32.totalorder %s2300_s9, %s2706_s0 }
  0x36   : > { %p2032_p3 = pnand %p2031_p0, %p2030_p13  ;;  %p2036_p9 = scmp.lt.u32.totalorder %s2034_s14, %s2029_s11 }
  0x37   : > { %p2038_p1 = scmp.lt.u32.totalorder %s2029_s11, %s2300_s9 }
  0x38   : > { %p2033_p5 = pneg %p2032_p3  ;;  %p2037_p2 = por %p2036_p9, %p2035_p7 }
  0x3a   : > { %p2039_p4 = por %p2038_p1, %p2037_p2 }
  0x3c   : > { %p2040_p6 = pnand %p2039_p4, %p2033_p5 }
  0x3e   : > { %2043 = shalt.err (!%p2040_p6)
}
  0x3f   : > { %s2044_s5 = scalar_lea.vmem %s2306_s28, 4096  ;;  %s2166_s7 = smov [#allocation2]  }
  0x40   : > { %p2045_p8 = scmp.ne.s32.totalorder %s2306_s28, %s2044_s5  ;;  %s2049_s26 = sshll.u32 %s2166_s7, 4  ;;  %s2050_s26 = int_to_ptr.vmem [resolvable:$false] %s2049_s26 }
  0x41   : > { %s2051_s8 = scalar_lea.vmem %s2050_s26, 8192  ;;  %p2052_p3 = scmp.lt.s32.totalorder %s2306_s28, %s2050_s26 }
  0x42   : > { %p2047_p10 = pnand %p2045_p8, %p2031_p0  ;;  %p2053_p7 = scmp.lt.s32.totalorder %s2051_s8, %s2044_s5 }
  0x44   : > { %p2048_p13 = pneg %p2047_p10  ;;  %p2054_p9 = por %p2053_p7, %p2052_p3 }
  0x46   : > { %p2055_p2 = pnand %p2054_p9, %p2048_p13 }
  0x48   : > { %2058 = shalt.err (!%p2055_p2)
}
  0x49   : > { %s2167_s25 = smov 64   ;;  %s2168_s11 = smov 4  }
  0x4a   : > { %1891 = dma.hbm_to_vmem [thread:$0]  (!%p2302_p11), %s2300_s9, 4096, %s2306_s28, %s2308_s10, %s2167_s25, %s2167_s25, %s2168_s11  }
  0x4b   : > { %p2721_p0 = scmp.ne.s32.totalorder %s2716_s23, 0 }
  0x4c   : > { %s2339_s12 = sand.u32 (!%p2721_p0), 1, %s2153_s16   ;;  %p2722_p5 = scmp.ne.s32.totalorder (!%p2721_p0), %s2714_s21, 0 }
  0x4d   : > { %202 = sbr.rel (%p2721_p0) target bundleno = 609 (0x261), region = 32  ;;  %s1637_s13 = sshll.u32 (!%p2721_p0), %s2339_s12, 8 }
  0x4e   : > { %s205_s14 = scalar_lea.sflag (!%p2721_p0), [#allocation3], %s2339_s12  ;;  %s2343_s20 = scalar_lea.vmem (!%p2721_p0), [#allocation2], %s1637_s13 }
  0x54   : > { %2132 = dma.done.wait (%p2722_p5), %s205_s14, 4096  }
  0x55   : > { %2134 = vsyncadd (%p2722_p5), %s205_s14, 4294963200  ;;  %p2723_p11 = scmp.eq.s32.totalorder %s2221_s19, 0 }
  0x57   : > { %2136 = dma.done.wait (%p2723_p11), [#allocation6], 2048   ;;  %p2724_p1 = pmov %p2723_p11 }
  0x58   : > { %v2169_v0 = vmov 0   ;;  %v1945_v1 = vld [vmem:[#allocation5 + $0x4] ss:$8 sps:$4 sm:$0xff]   ;;  %v1947_v2 = vld [vmem:[#allocation5] ss:$8 sps:$4 sm:$0xff]   ;;  %v1973_v21 = vld [vmem:[%s2343_s20 + $0x10] sm:$0xff]  }
  0x59   : > { %2138 = vsyncadd (%p2724_p1), [#allocation6], 4294965248  ;;  %435 = vmatprep.mubr.bf16.mxu0 %v2169_v0  ;;  %613 = vmatprep.mubr.bf16.mxu1 %v2169_v0  ;;  %v1948_v3 = vld [vmem:[#allocation5 + $0x14] ss:$8 sps:$4 sm:$0xff]   ;;  %v1950_v4 = vld [vmem:[#allocation5 + $0x10] ss:$8 sps:$4 sm:$0xff]  }
  0x5a   : > { %403 = vmatprep.subr.bf16.mxu0 %v1945_v1  ;;  %581 = vmatprep.subr.bf16.mxu1 %v1945_v1  ;;  %v1951_v5 = vld [vmem:[#allocation5 + $0x24] ss:$8 sps:$4 sm:$0xff]   ;;  %v1953_v6 = vld [vmem:[#allocation5 + $0x20] ss:$8 sps:$4 sm:$0xff]   ;;  %v1954_v7 = vld [vmem:[#allocation5 + $0x34] ss:$8 sps:$4 sm:$0xff]  }
  0x5b   : > { %404 = vmatpush1.bf16.msra.mxu0 %v1947_v2  ;;  %582 = vmatpush1.bf16.msra.mxu1 %v1947_v2  ;;  %v1956_v8 = vld [vmem:[#allocation5 + $0x30] ss:$8 sps:$4 sm:$0xff]   ;;  %v1957_v9 = vld [vmem:[#allocation5 + $0x44] ss:$8 sps:$4 sm:$0xff]   ;;  %v1959_v10 = vld [vmem:[#allocation5 + $0x40] ss:$8 sps:$4 sm:$0xff]  }
  0x5c   : > { %405 = vmatprep.subr.bf16.mxu0 %v1948_v3  ;;  %583 = vmatprep.subr.bf16.mxu1 %v1948_v3  ;;  %v1960_v11 = vld [vmem:[#allocation5 + $0x54] ss:$8 sps:$4 sm:$0xff]   ;;  %v1962_v12 = vld [vmem:[#allocation5 + $0x50] ss:$8 sps:$4 sm:$0xff]   ;;  %v1963_v13 = vld [vmem:[#allocation5 + $0x64] ss:$8 sps:$4 sm:$0xff]  }
  0x5d   : > { %v1965_v14 = vld [vmem:[#allocation5 + $0x60] ss:$8 sps:$4 sm:$0xff]   ;;  %v1966_v15 = vld [vmem:[#allocation5 + $0x74] ss:$8 sps:$4 sm:$0xff]   ;;  %v1968_v16 = vld [vmem:[#allocation5 + $0x70] ss:$8 sps:$4 sm:$0xff]  }
  0x5e   : > { %v1969_v17 = vld [vmem:[%s2343_s20] sm:$0xff]   ;;  %v1971_v19 = vld [vmem:[%s2343_s20 + $0x8] sm:$0xff]   ;;  %v1974_v22 = vld [vmem:[%s2343_s20 + $0x50] sm:$0xff]   ;;  %s1639_s9 = sshll.u32 %s2339_s12, 6  ;;  %s1802_s29 = sshll.u32 %s2221_s19, 10 }
  0x5f   : > { %406 = vmatpush1.bf16.msra.mxu0 %v1950_v4  ;;  %584 = vmatpush1.bf16.msra.mxu1 %v1950_v4  ;;  %v1970_v18 = vld [vmem:[%s2343_s20 + $0x40] sm:$0xff]   ;;  %v1972_v20 = vld [vmem:[%s2343_s20 + $0x48] sm:$0xff]   ;;  %v1975_v23 = vld [vmem:[%s2343_s20 + $0x18] sm:$0xff]   ;;  %s2548_s28 = scalar_lea.vmem [#allocation8], %s1639_s9  ;;  %s2608_s7 = scalar_lea.hbm %s2710_s4, %s1802_s29 }
  0x60   : > { %407 = vmatprep.subr.bf16.mxu0 %v1951_v5  ;;  %585 = vmatprep.subr.bf16.mxu1 %v1951_v5  ;;  %v1976_v24 = vld [vmem:[%s2343_s20 + $0x58] sm:$0xff]   ;;  %v1977_v25 = vld [vmem:[%s2343_s20 + $0x20] sm:$0xff]   ;;  %v1979_v27 = vld [vmem:[%s2343_s20 + $0x28] sm:$0xff]   ;;  %s1514_s10 = sshll.u32 %s2548_s28, 4  ;;  %s1485_s26 = scalar_lea.sflag [#allocation9], %s2339_s12  ;;  %s2610_s10 = int_to_ptr.vmem [resolvable:$true] %s1514_s10 }
  0x61   : > { %v1978_v26 = vld [vmem:[%s2343_s20 + $0x60] sm:$0xff]   ;;  %v1980_v28 = vld [vmem:[%s2343_s20 + $0x68] sm:$0xff]   ;;  %v1981_v29 = vld [vmem:[%s2343_s20 + $0x30] sm:$0xff]   ;;  %s2059_s8 = scalar_lea.vmem %s2610_s10, 1024  ;;  %s2171_s25 = smov [#allocation8]  }
  0x62   : > { %v1982_v30 = vld [vmem:[%s2343_s20 + $0x70] sm:$0xff]   ;;  %v1983_v31 = vld [vmem:[%s2343_s20 + $0x38] sm:$0xff]   ;;  %v1985_v33 = vld [vmem:[%s2343_s20 + $0x80] sm:$0xff]   ;;  %p2060_p4 = scmp.ne.s32.totalorder %s2610_s10, %s2059_s8  ;;  %s2063_s11 = sshll.u32 %s2171_s25, 4  ;;  %s2064_s11 = int_to_ptr.vmem [resolvable:$false] %s2063_s11 }
  0x63   : > { %408 = vmatpush1.bf16.msra.mxu0 %v1953_v6  ;;  %586 = vmatpush1.bf16.msra.mxu1 %v1953_v6  ;;  %v1984_v32 = vld [vmem:[%s2343_s20 + $0x78] sm:$0xff]   ;;  %v1986_v34 = vld [vmem:[%s2343_s20 + $0xc0] sm:$0xff]   ;;  %v1987_v35 = vld [vmem:[%s2343_s20 + $0x88] sm:$0xff]   ;;  %s2065_s13 = scalar_lea.vmem %s2064_s11, 2048  ;;  %p2066_p10 = scmp.lt.s32.totalorder %s2610_s10, %s2064_s11 }
  0x64   : > { %409 = vmatprep.subr.bf16.mxu0 %v1954_v7  ;;  %587 = vmatprep.subr.bf16.mxu1 %v1954_v7  ;;  %v1988_v36 = vld [vmem:[%s2343_s20 + $0xc8] sm:$0xff]   ;;  %v1989_v37 = vld [vmem:[%s2343_s20 + $0x90] sm:$0xff]   ;;  %v1991_v39 = vld [vmem:[%s2343_s20 + $0x98] sm:$0xff]   ;;  %p2061_p6 = pnand %p2060_p4, %p2291_p12  ;;  %p2067_p13 = scmp.lt.s32.totalorder %s2065_s13, %s2059_s8 }
  0x65   : > { %v1990_v38 = vld [vmem:[%s2343_s20 + $0xd0] sm:$0xff]   ;;  %v1992_v40 = vld [vmem:[%s2343_s20 + $0xd8] sm:$0xff]   ;;  %v1993_v41 = vld [vmem:[%s2343_s20 + $0xa0] sm:$0xff]  }
  0x66   : > { %v1994_v42 = vld [vmem:[%s2343_s20 + $0xe0] sm:$0xff]   ;;  %v1995_v43 = vld [vmem:[%s2343_s20 + $0xa8] sm:$0xff]   ;;  %v1997_v45 = vld [vmem:[%s2343_s20 + $0xb0] sm:$0xff]   ;;  %p2062_p8 = pneg %p2061_p6  ;;  %p2068_p3 = por %p2067_p13, %p2066_p10 }
  0x67   : > { %410 = vmatpush1.bf16.msra.mxu0 %v1956_v8  ;;  %588 = vmatpush1.bf16.msra.mxu1 %v1956_v8  ;;  %v1996_v44 = vld [vmem:[%s2343_s20 + $0xe8] sm:$0xff]   ;;  %v1998_v46 = vld [vmem:[%s2343_s20 + $0xf0] sm:$0xff]   ;;  %v1999_v47 = vld [vmem:[%s2343_s20 + $0xb8] sm:$0xff]  }
  0x68   : > { %411 = vmatprep.subr.bf16.mxu0 %v1957_v9  ;;  %589 = vmatprep.subr.bf16.mxu1 %v1957_v9  ;;  %v2000_v48 = vld [vmem:[%s2343_s20 + $0xf8] sm:$0xff]   ;;  %p2069_p7 = pnand %p2068_p3, %p2062_p8 }
  0x6b   : > { %412 = vmatpush1.bf16.msra.mxu0 %v1959_v10  ;;  %590 = vmatpush1.bf16.msra.mxu1 %v1959_v10 }
  0x6c   : > { %413 = vmatprep.subr.bf16.mxu0 %v1960_v11  ;;  %591 = vmatprep.subr.bf16.mxu1 %v1960_v11 }
  0x6f   : > { %414 = vmatpush1.bf16.msra.mxu0 %v1962_v12  ;;  %592 = vmatpush1.bf16.msra.mxu1 %v1962_v12 }
  0x70   : > { %415 = vmatprep.subr.bf16.mxu0 %v1963_v13  ;;  %593 = vmatprep.subr.bf16.mxu1 %v1963_v13 }
  0x73   : > { %416 = vmatpush1.bf16.msra.mxu0 %v1965_v14  ;;  %594 = vmatpush1.bf16.msra.mxu1 %v1965_v14 }
  0x74   : > { %417 = vmatprep.subr.bf16.mxu0 %v1966_v15  ;;  %595 = vmatprep.subr.bf16.mxu1 %v1966_v15 }
  0x77   : > { %418 = vmatpush1.bf16.msra.mxu0 %v1968_v16  ;;  %596 = vmatpush1.bf16.msra.mxu1 %v1968_v16 }
  0x78   : > { %791 = vmatprep.subr.bf16.mxu0 %v1945_v1  ;;  %1001 = vmatprep.subr.bf16.mxu1 %v1945_v1 }
  0x7a   : > { %436 = vmatmul.mubr.bf16.vlgmr.msra.gmra.mrb[0].mxu0 %v1969_v17  ;;  %614 = vmatmul.mubr.bf16.vlgmr.msra.gmra.mrb[0].mxu1 %v1970_v18 }
  0x7b   : > { %792 = vmatpush1.bf16.msra.mxu0 %v1947_v2  ;;  %1002 = vmatpush1.bf16.msra.mxu1 %v1947_v2 }
  0x7c   : > { %445 = vmatprep.mubr.bf16.mxu0 %v2169_v0  ;;  %623 = vmatprep.mubr.bf16.mxu1 %v2169_v0 }
  0x7d   : > { %793 = vmatprep.subr.bf16.mxu0 %v1948_v3  ;;  %1003 = vmatprep.subr.bf16.mxu1 %v1948_v3 }
  0x7f   : > { %794 = vmatpush1.bf16.msra.mxu0 %v1950_v4  ;;  %1004 = vmatpush1.bf16.msra.mxu1 %v1950_v4 }
  0x80   : > { %795 = vmatprep.subr.bf16.mxu0 %v1951_v5  ;;  %1005 = vmatprep.subr.bf16.mxu1 %v1951_v5 }
  0x82   : > { %446 = vmatmul.mubr.bf16.gmra.mrb[4].mxu0 %v1971_v19  ;;  %624 = vmatmul.mubr.bf16.gmra.mrb[4].mxu1 %v1972_v20 }
  0x83   : > { %455 = vmatprep.mubr.bf16.mxu0 %v2169_v0  ;;  %633 = vmatprep.mubr.bf16.mxu1 %v2169_v0 }
  0x84   : > { %796 = vmatpush1.bf16.msra.mxu0 %v1953_v6  ;;  %1006 = vmatpush1.bf16.msra.mxu1 %v1953_v6 }
  0x85   : > { %797 = vmatprep.subr.bf16.mxu0 %v1954_v7  ;;  %1007 = vmatprep.subr.bf16.mxu1 %v1954_v7 }
  0x88   : > { %798 = vmatpush1.bf16.msra.mxu0 %v1956_v8  ;;  %1008 = vmatpush1.bf16.msra.mxu1 %v1956_v8 }
  0x89   : > { %799 = vmatprep.subr.bf16.mxu0 %v1957_v9  ;;  %1009 = vmatprep.subr.bf16.mxu1 %v1957_v9 }
  0x8a   : > { %456 = vmatmul.mubr.bf16.gmra.mrb[8].mxu0 %v1973_v21  ;;  %634 = vmatmul.mubr.bf16.gmra.mrb[8].mxu1 %v1974_v22 }
  0x8b   : > { %465 = vmatprep.mubr.bf16.mxu0 %v2169_v0  ;;  %643 = vmatprep.mubr.bf16.mxu1 %v2169_v0 }
  0x8c   : > { %800 = vmatpush1.bf16.msra.mxu0 %v1959_v10  ;;  %1010 = vmatpush1.bf16.msra.mxu1 %v1959_v10 }
  0x8d   : > { %801 = vmatprep.subr.bf16.mxu0 %v1960_v11  ;;  %1011 = vmatprep.subr.bf16.mxu1 %v1960_v11 }
  0x90   : > { %802 = vmatpush1.bf16.msra.mxu0 %v1962_v12  ;;  %1012 = vmatpush1.bf16.msra.mxu1 %v1962_v12 }
  0x91   : > { %803 = vmatprep.subr.bf16.mxu0 %v1963_v13  ;;  %1013 = vmatprep.subr.bf16.mxu1 %v1963_v13 }
  0x92   : > { %466 = vmatmul.mubr.bf16.gmra.mrb[12].mxu0 %v1975_v23  ;;  %644 = vmatmul.mubr.bf16.gmra.mrb[12].mxu1 %v1976_v24 }
  0x93   : > { %475 = vmatprep.mubr.bf16.mxu0 %v2169_v0  ;;  %653 = vmatprep.mubr.bf16.mxu1 %v2169_v0 }
  0x94   : > { %804 = vmatpush1.bf16.msra.mxu0 %v1965_v14  ;;  %1014 = vmatpush1.bf16.msra.mxu1 %v1965_v14 }
  0x95   : > { %805 = vmatprep.subr.bf16.mxu0 %v1966_v15  ;;  %1015 = vmatprep.subr.bf16.mxu1 %v1966_v15 }
  0x98   : > { %806 = vmatpush1.bf16.msra.mxu0 %v1968_v16  ;;  %1016 = vmatpush1.bf16.msra.mxu1 %v1968_v16 }
  0x9a   : > { %476 = vmatmul.mubr.bf16.gmra.mrb[16].mxu0 %v1977_v25  ;;  %654 = vmatmul.mubr.bf16.gmra.mrb[16].mxu1 %v1978_v26 }
  0x9b   : > { %485 = vmatprep.mubr.bf16.mxu0 %v2169_v0  ;;  %663 = vmatprep.mubr.bf16.mxu1 %v2169_v0 }
  0xa2   : > { %486 = vmatmul.mubr.bf16.gmra.mrb[20].mxu0 %v1979_v27  ;;  %664 = vmatmul.mubr.bf16.gmra.mrb[20].mxu1 %v1980_v28 }
  0xa3   : > { %495 = vmatprep.mubr.bf16.mxu0 %v2169_v0  ;;  %673 = vmatprep.mubr.bf16.mxu1 %v2169_v0 }
  0xaa   : > { %496 = vmatmul.mubr.bf16.gmra.mrb[24].mxu0 %v1981_v29  ;;  %674 = vmatmul.mubr.bf16.gmra.mrb[24].mxu1 %v1982_v30 }
  0xab   : > { %505 = vmatprep.mubr.bf16.mxu0 %v2169_v0  ;;  %683 = vmatprep.mubr.bf16.mxu1 %v2169_v0 }
  0xb2   : > { %506 = vmatmul.mubr.bf16.gmra.mrb[28].mxu0 %v1983_v31  ;;  %684 = vmatmul.mubr.bf16.gmra.mrb[28].mxu1 %v1984_v32 }
  0xb3   : > { %823 = vmatprep.mubr.bf16.mxu0 %v2169_v0  ;;  %1033 = vmatprep.mubr.bf16.mxu1 %v2169_v0 }
  0xba   : > { %824 = vmatmul.mubr.bf16.vlgmr.msra.gmra.mrb[32].mxu0 %v1985_v33  ;;  %1034 = vmatmul.mubr.bf16.vlgmr.msra.gmra.mrb[32].mxu1 %v1986_v34 }
  0xbb   : > { %833 = vmatprep.mubr.bf16.mxu0 %v2169_v0  ;;  %1043 = vmatprep.mubr.bf16.mxu1 %v2169_v0 }
  0xc2   : > { %834 = vmatmul.mubr.bf16.gmra.mrb[36].mxu0 %v1987_v35  ;;  %1044 = vmatmul.mubr.bf16.gmra.mrb[36].mxu1 %v1988_v36 }
  0xc3   : > { %843 = vmatprep.mubr.bf16.mxu0 %v2169_v0  ;;  %1053 = vmatprep.mubr.bf16.mxu1 %v2169_v0 }
  0xca   : > { %844 = vmatmul.mubr.bf16.gmra.mrb[40].mxu0 %v1989_v37  ;;  %1054 = vmatmul.mubr.bf16.gmra.mrb[40].mxu1 %v1990_v38 }
  0xcb   : > { %853 = vmatprep.mubr.bf16.mxu0 %v2169_v0  ;;  %1063 = vmatprep.mubr.bf16.mxu1 %v2169_v0 }
  0xd2   : > { %854 = vmatmul.mubr.bf16.gmra.mrb[44].mxu0 %v1991_v39  ;;  %1064 = vmatmul.mubr.bf16.gmra.mrb[44].mxu1 %v1992_v40 }
  0xd3   : > { %863 = vmatprep.mubr.bf16.mxu0 %v2169_v0  ;;  %1073 = vmatprep.mubr.bf16.mxu1 %v2169_v0 }
  0xda   : > { %864 = vmatmul.mubr.bf16.gmra.mrb[48].mxu0 %v1993_v41  ;;  %1074 = vmatmul.mubr.bf16.gmra.mrb[48].mxu1 %v1994_v42 }
  0xdb   : > { %873 = vmatprep.mubr.bf16.mxu0 %v2169_v0  ;;  %1083 = vmatprep.mubr.bf16.mxu1 %v2169_v0 }
  0xe2   : > { %874 = vmatmul.mubr.bf16.gmra.mrb[52].mxu0 %v1995_v43  ;;  %1084 = vmatmul.mubr.bf16.gmra.mrb[52].mxu1 %v1996_v44 }
  0xe3   : > { %883 = vmatprep.mubr.bf16.mxu0 %v2169_v0  ;;  %1093 = vmatprep.mubr.bf16.mxu1 %v2169_v0 }
  0xea   : > { %884 = vmatmul.mubr.bf16.gmra.mrb[56].mxu0 %v1997_v45  ;;  %1094 = vmatmul.mubr.bf16.gmra.mrb[56].mxu1 %v1998_v46 }
  0xeb   : > { %893 = vmatprep.mubr.bf16.mxu0 %v2169_v0  ;;  %1103 = vmatprep.mubr.bf16.mxu1 %v2169_v0 }
  0xf2   : > { %894 = vmatmul.mubr.bf16.gmra.mrb[60].mxu0 %v1999_v47  ;;  %1104 = vmatmul.mubr.bf16.gmra.mrb[60].mxu1 %v2000_v48 }
 0x14d   : > { %v2417_v49 = vpop.f32.mrb[0].mxu0  ;;  %v2419_v50 = vpop.f32.mrb[0].mxu1 }
 0x14e   : > { %v694_v51 = vmax.f32 %v2417_v49, %v2419_v50  ;;  %v2423_v52 = vpop.f32.mrb[1].mxu0  ;;  %v2425_v53 = vpop.f32.mrb[1].mxu1 }
 0x14f   : > { %v695_v54 = vmax.f32 %v2423_v52, %v2425_v53  ;;  %v2429_v55 = vpop.f32.mrb[2].mxu0  ;;  %v2431_v56 = vpop.f32.mrb[2].mxu1 }
 0x150   : > { %v696_v57 = vmax.f32 %v2429_v55, %v2431_v56  ;;  %v2435_v58 = vpop.f32.mrb[3].mxu0  ;;  %v2437_v59 = vpop.f32.mrb[3].mxu1 }
 0x151   : > { %v697_v60 = vmax.f32 %v2435_v58, %v2437_v59 }
 0x155   : > { %v2441_v61 = vpop.f32.mrb[4].mxu0  ;;  %v2443_v62 = vpop.f32.mrb[4].mxu1 }
 0x156   : > { %v698_v63 = vmax.f32 %v2441_v61, %v2443_v62  ;;  %v2447_v0 = vpop.f32.mrb[5].mxu0  ;;  %v2449_v1 = vpop.f32.mrb[5].mxu1 }
 0x157   : > { %v699_v2 = vmax.f32 %v2447_v0, %v2449_v1  ;;  %v2453_v3 = vpop.f32.mrb[6].mxu0  ;;  %v2455_v4 = vpop.f32.mrb[6].mxu1 }
 0x158   : > { %v700_v5 = vmax.f32 %v2453_v3, %v2455_v4  ;;  %v2459_v6 = vpop.f32.mrb[7].mxu0  ;;  %v2461_v7 = vpop.f32.mrb[7].mxu1 }
 0x159   : > { %v701_v8 = vmax.f32 %v2459_v6, %v2461_v7 }
 0x15d   : > { %v2465_v9 = vpop.f32.mrb[8].mxu0  ;;  %v2467_v10 = vpop.f32.mrb[8].mxu1 }
 0x15e   : > { %v702_v11 = vmax.f32 %v2465_v9, %v2467_v10  ;;  %v2471_v12 = vpop.f32.mrb[9].mxu0  ;;  %v2473_v13 = vpop.f32.mrb[9].mxu1 }
 0x15f   : > { %v703_v14 = vmax.f32 %v2471_v12, %v2473_v13  ;;  %v2477_v15 = vpop.f32.mrb[10].mxu0  ;;  %v2479_v16 = vpop.f32.mrb[10].mxu1 }
 0x160   : > { %v704_v17 = vmax.f32 %v2477_v15, %v2479_v16  ;;  %v2483_v18 = vpop.f32.mrb[11].mxu0  ;;  %v2485_v19 = vpop.f32.mrb[11].mxu1 }
 0x161   : > { %v705_v20 = vmax.f32 %v2483_v18, %v2485_v19 }
 0x165   : > { %v2489_v21 = vpop.f32.mrb[12].mxu0  ;;  %v2491_v22 = vpop.f32.mrb[12].mxu1 }
 0x166   : > { %v2495_v24 = vpop.f32.mrb[13].mxu0  ;;  %v2497_v25 = vpop.f32.mrb[13].mxu1 }
 0x167   : > { %v2501_v27 = vpop.f32.mrb[14].mxu0  ;;  %v2503_v28 = vpop.f32.mrb[14].mxu1 }
 0x168   : > { %v2507_v30 = vpop.f32.mrb[15].mxu0  ;;  %v2509_v31 = vpop.f32.mrb[15].mxu1 }
 0x16d   : > { %v477_v33 = vpop.f32.mrb[16].mxu0  ;;  %v655_v34 = vpop.f32.mrb[16].mxu1 }
 0x16e   : > { %v479_v35 = vpop.f32.mrb[17].mxu0  ;;  %v657_v36 = vpop.f32.mrb[17].mxu1 }
 0x16f   : > { %v481_v37 = vpop.f32.mrb[18].mxu0  ;;  %v659_v38 = vpop.f32.mrb[18].mxu1 }
 0x170   : > { %v483_v39 = vpop.f32.mrb[19].mxu0  ;;  %v661_v40 = vpop.f32.mrb[19].mxu1  ;;  %v1181_v37 = vlaneseq }
 0x175   : > { %v487_v41 = vpop.f32.mrb[20].mxu0  ;;  %v665_v42 = vpop.f32.mrb[20].mxu1 }
 0x176   : > { %v489_v43 = vpop.f32.mrb[21].mxu0  ;;  %v667_v44 = vpop.f32.mrb[21].mxu1  ;;  %v1182_v42 = vshrl.u32 %v1181_v37, 7 }
 0x177   : > { %v491_v45 = vpop.f32.mrb[22].mxu0  ;;  %v669_v46 = vpop.f32.mrb[22].mxu1 }
 0x178   : > { %v493_v47 = vpop.f32.mrb[23].mxu0  ;;  %v671_v48 = vpop.f32.mrb[23].mxu1 }
 0x179   : > { %v1183_v47 = vsub.s32 0, %v1182_v42 }
 0x17d   : > { %v497_v29 = vpop.f32.mrb[24].mxu0  ;;  %v675_v26 = vpop.f32.mrb[24].mxu1 }
 0x17e   : > { %v499_v23 = vpop.f32.mrb[25].mxu0  ;;  %v677_v32 = vpop.f32.mrb[25].mxu1 }
 0x17f   : > { %v501_v33 = vpop.f32.mrb[26].mxu0  ;;  %v679_v34 = vpop.f32.mrb[26].mxu1  ;;  %v1179_v23 = vld [vmem:[%s2708_s2] sm:$0x3]  ;;  %v1187_v32 = vsub.s32 1, %v1182_v42 }
 0x180   : > { %v503_v35 = vpop.f32.mrb[27].mxu0  ;;  %v681_v36 = vpop.f32.mrb[27].mxu1 }
 0x181   : > { %v2519_v35 = vrot.slane %v1179_v23, %v1183_v47  ;;  %v2527_v50 = vrot.slane %v1179_v23, %v1187_v32 }
 0x185   : > { %v507_v38 = vpop.f32.mrb[28].mxu0  ;;  %v685_v39 = vpop.f32.mrb[28].mxu1 }
 0x186   : > { %v509_v40 = vpop.f32.mrb[29].mxu0  ;;  %v687_v41 = vpop.f32.mrb[29].mxu1 }
 0x187   : > { %v511_v43 = vpop.f32.mrb[30].mxu0  ;;  %v689_v44 = vpop.f32.mrb[30].mxu1 }
 0x188   : > { %v513_v45 = vpop.f32.mrb[31].mxu0  ;;  %v691_v46 = vpop.f32.mrb[31].mxu1 }
 0x18d   : > { %v825_v26 = vpop.f32.mrb[32].mxu0  ;;  %v1035_v29 = vpop.f32.mrb[32].mxu1 }
 0x18e   : > { %v904_v48 = vmax.f32 %v694_v51, %v825_v26  ;;  %v827_v33 = vpop.f32.mrb[33].mxu0  ;;  %v1037_v34 = vpop.f32.mrb[33].mxu1 }
 0x18f   : > { %v905_v36 = vmax.f32 %v695_v54, %v827_v33  ;;  %v829_v37 = vpop.f32.mrb[34].mxu0  ;;  %v1039_v38 = vpop.f32.mrb[34].mxu1 }
 0x190   : > { %v1114_v39 = vmax.f32 %v904_v48, %v1035_v29  ;;  %v906_v40 = vmax.f32 %v696_v57, %v829_v37  ;;  %v831_v41 = vpop.f32.mrb[35].mxu0  ;;  %v1041_v42 = vpop.f32.mrb[35].mxu1 }
 0x191   : > { %v1115_v49 = vmax.f32 %v905_v36, %v1037_v34  ;;  %v907_v51 = vmax.f32 %v697_v60, %v831_v41 }
 0x192   : > { %v1116_v43 = vmax.f32 %v906_v40, %v1039_v38  ;;  %v1191_v52 = vadd.f32 %v2519_v35, %v1114_v39 }
 0x193   : > { %v1117_v53 = vmax.f32 %v907_v51, %v1041_v42  ;;  %v1192_v54 = vadd.f32 %v2527_v50, %v1115_v49 }
 0x194   : > { %1287 = vxpose.xlu0.b32.start [1/8] (short) %v1191_v52, 128  ;;  %v1193_v59 = vadd.f32 %v2519_v35, %v1116_v43 }
 0x195   : > { %v1194_v55 = vadd.f32 %v2527_v50, %v1117_v53  ;;  %v835_v56 = vpop.f32.mrb[36].mxu0  ;;  %v1045_v57 = vpop.f32.mrb[36].mxu1 }
 0x196   : > { %v908_v44 = vmax.f32 %v698_v63, %v835_v56  ;;  %v837_v45 = vpop.f32.mrb[37].mxu0  ;;  %v1047_v58 = vpop.f32.mrb[37].mxu1 }
 0x197   : > { %v1847_v60 = vpack.c.bf16 %v1194_v55, %v1192_v54  ;;  %v909_v46 = vmax.f32 %v699_v2, %v837_v45  ;;  %v839_v47 = vpop.f32.mrb[38].mxu0  ;;  %v1049_v23 = vpop.f32.mrb[38].mxu1 }
 0x198   : > { %v1118_v26 = vmax.f32 %v908_v44, %v1045_v57  ;;  %v910_v29 = vmax.f32 %v700_v5, %v839_v47  ;;  %v1051_v32 = vpop.f32.mrb[39].mxu1  ;;  %1288 = vxpose.xlu0.b32.cont [2/8] (short) %v1193_v59, 128  ;;  %v841_v61 = vpop.f32.mrb[39].mxu0  ;;  %v2727_v57 = vmax.f32 %v2501_v27, %v2503_v28 }
 0x199   : > { %1848 = vst [vmem:[%s2548_s28] sm:$0xff] %v1847_v60   ;;  %v1119_v62 = vmax.f32 %v909_v46, %v1047_v58  ;;  %v911_v63 = vmax.f32 %v701_v8, %v841_v61  ;;  %v2728_v58 = vmax.f32 %v2507_v30, %v2509_v31 }
 0x19a   : > { %v1120_v0 = vmax.f32 %v910_v29, %v1049_v23  ;;  %v1195_v1 = vadd.f32 %v2519_v35, %v1118_v26 }
 0x19b   : > { %v1121_v2 = vmax.f32 %v911_v63, %v1051_v32  ;;  %v1196_v3 = vadd.f32 %v2527_v50, %v1119_v62 }
 0x19c   : > { %1289 = vxpose.xlu0.b32.cont [3/8] (short) %v1195_v1, 128  ;;  %v1197_v6 = vadd.f32 %v2519_v35, %v1120_v0 }
 0x19d   : > { %v1198_v4 = vadd.f32 %v2527_v50, %v1121_v2  ;;  %v845_v5 = vpop.f32.mrb[40].mxu0  ;;  %v1055_v48 = vpop.f32.mrb[40].mxu1 }
 0x19e   : > { %v912_v33 = vmax.f32 %v702_v11, %v845_v5  ;;  %v847_v34 = vpop.f32.mrb[41].mxu0  ;;  %v1057_v36 = vpop.f32.mrb[41].mxu1 }
 0x19f   : > { %v1852_v7 = vpack.c.bf16 %v1198_v4, %v1196_v3  ;;  %v913_v8 = vmax.f32 %v703_v14, %v847_v34  ;;  %v849_v37 = vpop.f32.mrb[42].mxu0  ;;  %v1059_v38 = vpop.f32.mrb[42].mxu1 }
 0x1a0   : > { %v1122_v39 = vmax.f32 %v912_v33, %v1055_v48  ;;  %v914_v40 = vmax.f32 %v704_v17, %v849_v37  ;;  %v1061_v41 = vpop.f32.mrb[43].mxu1  ;;  %1290 = vxpose.xlu0.b32.cont [4/8] (short) %v1197_v6, 128  ;;  %v851_v9 = vpop.f32.mrb[43].mxu0  ;;  %v2725_v17 = vmax.f32 %v2489_v21, %v2491_v22 }
 0x1a1   : > { %1871 = vst [vmem:[%s2548_s28 + $0x8] sm:$0xff] %v1852_v7   ;;  %v1123_v10 = vmax.f32 %v913_v8, %v1057_v36  ;;  %v915_v11 = vmax.f32 %v705_v20, %v851_v9  ;;  %v2726_v20 = vmax.f32 %v2495_v24, %v2497_v25 }
 0x1a2   : > { %v1124_v42 = vmax.f32 %v914_v40, %v1059_v38  ;;  %v1199_v12 = vadd.f32 %v2519_v35, %v1122_v39 }
 0x1a3   : > { %v1125_v13 = vmax.f32 %v915_v11, %v1061_v41  ;;  %v1200_v14 = vadd.f32 %v2527_v50, %v1123_v10 }
 0x1a4   : > { %1291 = vxpose.xlu0.b32.cont [5/8] (short) %v1199_v12, 128  ;;  %v1201_v18 = vadd.f32 %v2519_v35, %v1124_v42  ;;  %v2170_v42 = vmov 0.0|0.0  }
 0x1a5   : > { %v1202_v49 = vadd.f32 %v2527_v50, %v1125_v13  ;;  %v855_v15 = vpop.f32.mrb[44].mxu0  ;;  %v1065_v16 = vpop.f32.mrb[44].mxu1  ;;  %v1761_v12 = vcombine.low %v2170_v42, %v2170_v42  ;;  %v1762_v13 = vcombine.high %v2170_v42, %v2170_v42 }
 0x1a6   : > { %v916_v51 = vmax.f32 %v2725_v17, %v855_v15  ;;  %v857_v43 = vpop.f32.mrb[45].mxu0  ;;  %v1067_v52 = vpop.f32.mrb[45].mxu1 }
 0x1a7   : > { %v1857_v19 = vpack.c.bf16 %v1202_v49, %v1200_v14  ;;  %v917_v53 = vmax.f32 %v2726_v20, %v857_v43  ;;  %v859_v54 = vpop.f32.mrb[46].mxu0  ;;  %v1069_v55 = vpop.f32.mrb[46].mxu1  ;;  %1471 = vst [vmem:[%s2548_s28 + $0x20] sm:$0xf] %v1761_v12  ;;  %1472 = vst [vmem:[%s2548_s28 + $0x24] sm:$0xf] %v1762_v13 }
 0x1a8   : > { %v1126_v56 = vmax.f32 %v916_v51, %v1065_v16  ;;  %v918_v44 = vmax.f32 %v2727_v57, %v859_v54  ;;  %v1071_v45 = vpop.f32.mrb[47].mxu1  ;;  %1292 = vxpose.xlu0.b32.cont [6/8] (short) %v1201_v18, 128  ;;  %v861_v21 = vpop.f32.mrb[47].mxu0  ;;  %1473 = vst [vmem:[%s2548_s28 + $0x28] sm:$0xf] %v1761_v12  ;;  %1474 = vst [vmem:[%s2548_s28 + $0x2c] sm:$0xf] %v1762_v13 }
 0x1a9   : > { %1872 = vst [vmem:[%s2548_s28 + $0x10] sm:$0xff] %v1857_v19   ;;  %v1127_v22 = vmax.f32 %v917_v53, %v1067_v52  ;;  %v919_v59 = vmax.f32 %v2728_v58, %v861_v21  ;;  %1475 = vst [vmem:[%s2548_s28 + $0x30] sm:$0xf] %v1761_v12 }
 0x1aa   : > { %v1128_v60 = vmax.f32 %v918_v44, %v1069_v55  ;;  %v1203_v24 = vadd.f32 %v2519_v35, %v1126_v56  ;;  %1476 = vst [vmem:[%s2548_s28 + $0x34] sm:$0xf] %v1762_v13  ;;  %1477 = vst [vmem:[%s2548_s28 + $0x38] sm:$0xf] %v1761_v12 }
 0x1ab   : > { %v1129_v25 = vmax.f32 %v919_v59, %v1071_v45  ;;  %v1204_v46 = vadd.f32 %v2527_v50, %v1127_v22  ;;  %1478 = vst [vmem:[%s2548_s28 + $0x3c] sm:$0xf] %v1762_v13 }
 0x1ac   : > { %1293 = vxpose.xlu0.b32.cont [7/8] (short) %v1203_v24, 128  ;;  %v1205_v28 = vadd.f32 %v2519_v35, %v1128_v60 }
 0x1ad   : > { %v1206_v27 = vadd.f32 %v2527_v50, %v1129_v25  ;;  %v865_v23 = vpop.f32.mrb[48].mxu0  ;;  %v1075_v26 = vpop.f32.mrb[48].mxu1 }
 0x1ae   : > { %v1077_v29 = vpop.f32.mrb[49].mxu1  ;;  %v867_v32 = vpop.f32.mrb[49].mxu0 }
 0x1af   : > { %v1862_v47 = vpack.c.bf16 %v1206_v27, %v1204_v46  ;;  %v869_v30 = vpop.f32.mrb[50].mxu0  ;;  %v1079_v31 = vpop.f32.mrb[50].mxu1 }
 0x1b0   : > { %1294 = vxpose.xlu0.b32.end [8/8] (short) %v1205_v28, 128  ;;  %v871_v61 = vpop.f32.mrb[51].mxu0  ;;  %v1081_v62 = vpop.f32.mrb[51].mxu1 }
 0x1b1   : > { %1873 = vst [vmem:[%s2548_s28 + $0x18] sm:$0xff] %v1862_v47  }
 0x1b5   : > { %v875_v63 = vpop.f32.mrb[52].mxu0  ;;  %v1085_v0 = vpop.f32.mrb[52].mxu1 }
 0x1b6   : > { %v1087_v1 = vpop.f32.mrb[53].mxu1  ;;  %v877_v2 = vpop.f32.mrb[53].mxu0 }
 0x1b7   : > { %v879_v3 = vpop.f32.mrb[54].mxu0  ;;  %v1089_v4 = vpop.f32.mrb[54].mxu1 }
 0x1b8   : > { %v881_v50 = vpop.f32.mrb[55].mxu0  ;;  %v1091_v5 = vpop.f32.mrb[55].mxu1 }
 0x1bd   : > { %v885_v35 = vpop.f32.mrb[56].mxu0  ;;  %v1095_v48 = vpop.f32.mrb[56].mxu1 }
 0x1be   : > { %v1097_v33 = vpop.f32.mrb[57].mxu1  ;;  %v887_v34 = vpop.f32.mrb[57].mxu0 }
 0x1bf   : > { %v889_v36 = vpop.f32.mrb[58].mxu0  ;;  %v1099_v6 = vpop.f32.mrb[58].mxu1 }
 0x1c0   : > { %v891_v7 = vpop.f32.mrb[59].mxu0  ;;  %v1101_v8 = vpop.f32.mrb[59].mxu1 }
 0x1c5   : > { %v895_v37 = vpop.f32.mrb[60].mxu0  ;;  %v1105_v38 = vpop.f32.mrb[60].mxu1 }
 0x1c6   : > { %v1107_v39 = vpop.f32.mrb[61].mxu1  ;;  %v897_v40 = vpop.f32.mrb[61].mxu0 }
 0x1c7   : > { %v899_v41 = vpop.f32.mrb[62].mxu0  ;;  %v1109_v9 = vpop.f32.mrb[62].mxu1 }
 0x1c8   : > { %v901_v10 = vpop.f32.mrb[63].mxu0  ;;  %v1111_v11 = vpop.f32.mrb[63].mxu1 }
 0x1c9   : > { %2072 = shalt.err (!%p2069_p7)
}
 0x1ca   : > { %s2073_s14 = scalar_lea.hbm %s2608_s7, 1024  ;;  %s2077_s23 = scalar_lea.hbm %s2710_s4, 2048 }
 0x1cb   : > { %p2074_p9 = scmp.ne.s32.totalorder %s2608_s7, %s2073_s14  ;;  %p2078_p5 = scmp.lt.u32.totalorder %s2608_s7, %s2710_s4 }
 0x1cc   : > { %p2079_p11 = scmp.lt.u32.totalorder %s2077_s23, %s2073_s14  ;;  %p2081_p4 = scmp.lt.u32.totalorder %s2073_s14, %s2608_s7 }
 0x1cd   : > { %p2075_p2 = pnand %p2074_p9, %p2291_p12 }
 0x1ce   : > { %p2080_p1 = por %p2079_p11, %p2078_p5 }
 0x1cf   : > { %p2076_p0 = pneg %p2075_p2 }
 0x1d0   : > { %p2082_p6 = por %p2081_p4, %p2080_p1 }
 0x1d2   : > { %p2083_p8 = pnand %p2082_p6, %p2076_p0 }
 0x1d4   : > { %2086 = shalt.err (!%p2083_p8)
}
 0x1d5   : > { %s2172_s5 = smov 64   ;;  %s2173_s8 = smov 4  }
 0x1d6   : > { %1881 = dma.vmem_to_hbm [thread:$0]  (%p2291_p12), %s2610_s10, 1024, %s2608_s7, %s1485_s26, %s2172_s5, %s2172_s5, %s2173_s8  }
 0x1d7   : > { %s2641_s25 = scalar_lea.vmem [#allocation7], %s1639_s9  ;;  %s2658_s26 = scalar_lea.hbm %s2709_s3, %s1802_s29 }
 0x1d8   : > { %s1498_s9 = sshll.u32 %s2641_s25, 4  ;;  %s1480_s11 = scalar_lea.sflag [#allocation4], %s2339_s12  ;;  %s2651_s9 = int_to_ptr.vmem [resolvable:$true] %s1498_s9 }
 0x1d9   : > { %s2087_s13 = scalar_lea.vmem %s2651_s9, 1024  ;;  %s2174_s14 = smov [#allocation7]  }
 0x1da   : > { %p2088_p10 = scmp.ne.s32.totalorder %s2651_s9, %s2087_s13  ;;  %s2091_s20 = sshll.u32 %s2174_s14, 4  ;;  %s2092_s20 = int_to_ptr.vmem [resolvable:$false] %s2091_s20 }
 0x1db   : > { %s2093_s21 = scalar_lea.vmem %s2092_s20, 2048  ;;  %p2094_p7 = scmp.lt.s32.totalorder %s2651_s9, %s2092_s20 }
 0x1dc   : > { %p2089_p13 = pnand %p2088_p10, %p2291_p12  ;;  %p2095_p9 = scmp.lt.s32.totalorder %s2093_s21, %s2087_s13 }
 0x1de   : > { %p2090_p3 = pneg %p2089_p13  ;;  %p2096_p2 = por %p2095_p9, %p2094_p7 }
 0x1e0   : > { %p2097_p0 = pnand %p2096_p2, %p2090_p3 }
 0x214   : > { %v1303_v14 = vpop.trf.xlu0 }
 0x218   : > { %v1304_v49 = vpop.trf.xlu0 }
 0x219   : > { %v1807_v15 = vpack.c.bf16 %v1304_v49, %v1303_v14 }
 0x21b   : > { %1808 = vst [vmem:[%s2641_s25] sm:$0xff] %v1807_v15  }
 0x21c   : > { %v1305_v16 = vpop.trf.xlu0 }
 0x220   : > { %v1306_v17 = vpop.trf.xlu0 }
 0x221   : > { %v1812_v51 = vpack.c.bf16 %v1306_v17, %v1305_v16 }
 0x223   : > { %1864 = vst [vmem:[%s2641_s25 + $0x8] sm:$0xff] %v1812_v51  }
 0x224   : > { %v1307_v43 = vpop.trf.xlu0 }
 0x228   : > { %v1308_v52 = vpop.trf.xlu0 }
 0x229   : > { %v1817_v18 = vpack.c.bf16 %v1308_v52, %v1307_v43 }
 0x22b   : > { %1865 = vst [vmem:[%s2641_s25 + $0x10] sm:$0xff] %v1817_v18  }
 0x22c   : > { %v1309_v19 = vpop.trf.xlu0 }
 0x230   : > { %v1310_v20 = vpop.trf.xlu0 }
 0x231   : > { %v1822_v53 = vpack.c.bf16 %v1310_v20, %v1309_v19 }
 0x233   : > { %1866 = vst [vmem:[%s2641_s25 + $0x18] sm:$0xff] %v1822_v53  }
 0x234   : > { %v1311_v54 = vpop.trf.xlu0 }
 0x238   : > { %v1312_v55 = vpop.trf.xlu0 }
 0x239   : > { %v1827_v56 = vpack.c.bf16 %v1312_v55, %v1311_v54 }
 0x23b   : > { %1867 = vst [vmem:[%s2641_s25 + $0x20] sm:$0xff] %v1827_v56  }
 0x23c   : > { %v1313_v57 = vpop.trf.xlu0 }
 0x240   : > { %v1314_v44 = vpop.trf.xlu0 }
 0x241   : > { %v1832_v45 = vpack.c.bf16 %v1314_v44, %v1313_v57 }
 0x243   : > { %1868 = vst [vmem:[%s2641_s25 + $0x28] sm:$0xff] %v1832_v45  }
 0x244   : > { %v1315_v21 = vpop.trf.xlu0 }
 0x248   : > { %v1316_v22 = vpop.trf.xlu0 }
 0x249   : > { %v1837_v58 = vpack.c.bf16 %v1316_v22, %v1315_v21 }
 0x24b   : > { %1869 = vst [vmem:[%s2641_s25 + $0x30] sm:$0xff] %v1837_v58  }
 0x24c   : > { %v1317_v59 = vpop.trf.xlu0 }
 0x250   : > { %v1318_v60 = vpop.trf.xlu0 }
 0x251   : > { %v1842_v24 = vpack.c.bf16 %v1318_v60, %v1317_v59 }
 0x253   : > { %1870 = vst [vmem:[%s2641_s25 + $0x38] sm:$0xff] %v1842_v24  }
 0x254   : > { %2100 = shalt.err (!%p2097_p0)
}
 0x255   : > { %s2101_s19 = scalar_lea.hbm %s2658_s26, 1024  ;;  %s2105_s28 = scalar_lea.hbm %s2709_s3, 2048 }
 0x256   : > { %p2102_p5 = scmp.ne.s32.totalorder %s2658_s26, %s2101_s19  ;;  %p2106_p4 = scmp.lt.u32.totalorder %s2658_s26, %s2709_s3 }
 0x257   : > { %p2107_p6 = scmp.lt.u32.totalorder %s2105_s28, %s2101_s19  ;;  %p2109_p10 = scmp.lt.u32.totalorder %s2101_s19, %s2658_s26 }
 0x258   : > { %p2103_p11 = pnand %p2102_p5, %p2291_p12 }
 0x259   : > { %p2108_p8 = por %p2107_p6, %p2106_p4 }
 0x25a   : > { %p2104_p1 = pneg %p2103_p11 }
 0x25b   : > { %p2110_p13 = por %p2109_p10, %p2108_p8 }
 0x25d   : > { %p2111_p3 = pnand %p2110_p13, %p2104_p1 }
 0x25f   : > { %2114 = shalt.err (!%p2111_p3)
}
 0x260   : > { %1880 = dma.vmem_to_hbm [thread:$0]  (%p2291_p12), %s2651_s9, 1024, %s2658_s26, %s1480_s11, %s2172_s5, %s2172_s5, %s2173_s8  }
 0x261 PF: > { %s1529_s10 = sand.u32 1, %s2149_s15   ;;  %p2729_p7 = scmp.ne.s32.totalorder %s2715_s22, 0 }
 0x262   : > { %p2730_p9 = scmp.ge.s32.totalorder %s2161_s18, 2  ;;  %s1530_s7 = scalar_lea.sflag [#allocation4], %s1529_s10 }
 0x264   : > { %p1893_p2 = pnand %p2730_p9, %p2729_p7 }
 0x266   : > { %2140 = dma.done.wait (!%p1893_p2), %s1530_s7, 1024  }
 0x267   : > { %2142 = vsyncadd (!%p1893_p2), %s1530_s7, 4294966272  ;;  %s1539_s30 = scalar_lea.sflag [#allocation9], %s1529_s10 }
 0x268   : > { %2144 = dma.done.wait (!%p1893_p2), %s1539_s30, 1024  }
 0x269   : > { %2146 = vsyncadd (!%p1893_p2), %s1539_s30, 4294966272  ;;  %p22_p12 = scmp.ge.s32.totalorder %s2256_s27, 4   ;;  %s2731_s15 = smov %s2153_s16 }
 0x26a   : > { %s2732_s16 = smov %s2157_s17  ;;  %s2733_s17 = smov %s2287_s24 }
 0x26b   : > { %s2734_s18 = smov %s2256_s27  ;;  %24 = sbr.rel (!%p22_p12) target bundleno = 8 (0x8), region = 101 }
 0x272   :  { %1544 = vsyncpa [#allocation3], 1 }
 0x273   :  { %1546 = vsyncpa [#allocation3 + $0x1], 1 }
 0x274   :  { %1547 = vsyncpa [#allocation6], 1 }
 0x275   :  { %1548 = vsyncpa [#allocation4], 1 }
 0x276   :  { %1550 = vsyncpa [#allocation4 + $0x1], 1 }
 0x277   :  { %1551 = vsyncpa [#allocation9], 1 }
 0x278   :  { %1553 = vsyncpa [#allocation9 + $0x1], 1 }

</bundles_post_ra>
